<compile_context>
chip_gen: v6e
topology: v6e:2x2x1
jax: 0.10.0
libtpu: 0.0.40
codegen_flags: <defaults>
</compile_context>

<pallas_src>
import math

import jax
import jax.numpy as jnp
from jax.experimental import pallas as pl
from jax.experimental.pallas import tpu as pltpu


# ------------------------------- Pallas kernel -------------------------------

def _add_pe_kernel(x_ref, pe_ref, o_ref):
    # x_ref / o_ref: (Bb, tm, D) VMEM tiles; pe_ref: (1, tm, D), broadcast over the batch fold.
    # Pure memory-bound elementwise add; dropout is identity in eval mode.
    # TODO(synk): training-mode dropout (p=0.1) would need pltpu.prng_* masking + 1/(1-p) scale.
    o_ref[...] = (x_ref[...] + pe_ref[...]).astype(o_ref.dtype)


def _choose_block(B, S, D, itemsize, target_block_bytes):
    """Pick (Bb, tm): batch-fold and sequence-row tile sized by bytes, not a fixed row cap."""
    row_bytes = max(D * itemsize, 1)          # one (1, 1, D) row
    rows_fit = target_block_bytes // row_bytes
    if rows_fit >= S:
        # Whole sequence fits one block (full dim -> no (8,128) divisibility issue even for
        # odd S). Fold batch rows in until we hit the byte target.
        tm = S
        bb = int(max(1, min(B, target_block_bytes // (S * row_bytes))))
    else:
        # Tile the sequence; multiple of 8 for sublane alignment, cdiv grid pads the tail.
        tm = int(max(8, (rows_fit // 8) * 8))
        bb = 1
    return bb, tm


def positional_encoding_forward(embedding, pos_encoding, *,
                                vmem_budget_bytes=12 * 1024 * 1024,
                                donate_embedding=False):
    """embedding: (B, S, D); pos_encoding: (1, S, D)  ->  (B, S, D).

    vmem_budget_bytes bounds the total double-buffered working set
    (3 streams x 2 buffers x block_bytes); the default 12 MiB stays under every
    generation's default scoped VMEM limit (v5e 16 MiB, v6e/v7x 32 MiB).
    """
    B, S, D = embedding.shape
    assert pos_encoding.shape == (1, S, D), "n_words must equal n_rows (as in the module)"

    # Stream the PE table in the activation dtype (halves PE HBM bytes for bf16 activations).
    if pos_encoding.dtype != embedding.dtype:
        pos_encoding = pos_encoding.astype(embedding.dtype)

    itemsize = jnp.dtype(embedding.dtype).itemsize
    target_block_bytes = max(vmem_budget_bytes // 6, 64 * 1024)
    bb, tm = _choose_block(B, S, D, itemsize, target_block_bytes)

    # Rows outer, batch inner -> PE block index constant across the inner axis (tile reuse).
    grid = (pl.cdiv(S, tm), pl.cdiv(B, bb))

    return pl.pallas_call(
        _add_pe_kernel,
        out_shape=jax.ShapeDtypeStruct((B, S, D), embedding.dtype),
        grid=grid,
        in_specs=[
            pl.BlockSpec((bb, tm, D), lambda r, b: (b, r, 0)),   # embedding tile
            pl.BlockSpec((1, tm, D), lambda r, b: (0, r, 0)),    # PE tile (batch-invariant)
        ],
        out_specs=pl.BlockSpec((bb, tm, D), lambda r, b: (b, r, 0)),
        input_output_aliases={0: 0} if donate_embedding else {},
        compiler_params=pltpu.CompilerParams(
            dimension_semantics=("parallel", "parallel")),
    )(embedding, pos_encoding)


# ------------------------- Constant buffer (as __init__) ---------------------

def make_positional_encoding(n_rows, d_model, dtype=jnp.float32):
    """Same formula as the PyTorch module: sin on even cols, cos on odd cols."""
    positions = jnp.arange(n_rows, dtype=jnp.float32)[:, None]           # (n_rows, 1)
    i = jnp.arange(0, d_model, 2, dtype=jnp.float32)                     # (d_model/2,)
    angles = positions * jnp.exp(-i * math.log(10000.0) / d_model)       # (n_rows, d/2)
    pe = jnp.zeros((n_rows, d_model), jnp.float32)
    pe = pe.at[:, 0::2].set(jnp.sin(angles))
    pe = pe.at[:, 1::2].set(jnp.cos(angles))
    return pe[None, :, :].astype(dtype)                                  # (1, n_rows, d)


# ----------------------------------- Main -------------------------------------

if __name__ == "__main__":
    # Shapes consistent with the module: MAX_LENGTH rows, d_model = 512.
    MAX_LENGTH = 10
    batch, n_rows, d_model = 2, MAX_LENGTH, 512

    key = jax.random.PRNGKey(0)
    embedding = jax.random.normal(key, (batch, n_rows, d_model), jnp.float32)
    pos_encoding = make_positional_encoding(n_rows, d_model)

    out = jax.block_until_ready(positional_encoding_forward(embedding, pos_encoding))
    ref = pos_encoding + embedding  # plain-JAX reference (dropout = identity in eval)
    assert out.shape == (batch, n_rows, d_model)
    assert bool(jnp.allclose(out, ref, atol=1e-6, rtol=1e-6))

    # Exercise batch folding with a ragged batch block (B=3, Bb=2) and full-seq tile.
    B2, S2, D2 = 3, 1000, 256
    emb2 = jax.random.normal(jax.random.PRNGKey(1), (B2, S2, D2), jnp.float32)
    pe2 = make_positional_encoding(S2, D2)
    out2 = jax.block_until_ready(positional_encoding_forward(emb2, pe2))
    assert bool(jnp.allclose(out2, pe2 + emb2, atol=1e-6, rtol=1e-6))

    # Exercise the cdiv row-tiling path (non-divisible S with a partial trailing block)
    # by shrinking the VMEM budget so tm < S.
    out3 = jax.block_until_ready(
        positional_encoding_forward(emb2, pe2, vmem_budget_bytes=6 * 64 * 1024))
    assert bool(jnp.allclose(out3, pe2 + emb2, atol=1e-6, rtol=1e-6))

    print("KERNEL_OK")
</pallas_src>

<mosaic_0001>
module attributes {stable_mosaic.version = 11 : i64} {
  func.func @_add_pe_kernel(%arg0: i32, %arg1: i32, %arg2: memref<2x10x512xf32, #tpu.memory_space<vmem>>, %arg3: memref<1x10x512xf32, #tpu.memory_space<vmem>>, %arg4: memref<2x10x512xf32, #tpu.memory_space<vmem>>) attributes {dimension_semantics = [#tpu.dimension_semantics<parallel>, #tpu.dimension_semantics<parallel>], iteration_bounds = array<i64: 1, 1>, scalar_prefetch = 0 : i64, scratch_operands = 0 : i64, tpu.core_type = #tpu.core_type<tc>, window_params = [{transform_indices = @transform_0, window_bounds = array<i64: 2, 10, 512>}, {transform_indices = @transform_1, window_bounds = array<i64: 1, 10, 512>}, {transform_indices = @transform_2, window_bounds = array<i64: 2, 10, 512>}]} {
    %c0 = arith.constant 0 : index
    %c0_0 = arith.constant 0 : index
    %c0_1 = arith.constant 0 : index
    %0 = vector.load %arg2[%c0, %c0_0, %c0_1] : memref<2x10x512xf32, #tpu.memory_space<vmem>>, vector<2x10x512xf32>
    %c0_2 = arith.constant 0 : index
    %c0_3 = arith.constant 0 : index
    %c0_4 = arith.constant 0 : index
    %1 = vector.load %arg3[%c0_2, %c0_3, %c0_4] : memref<1x10x512xf32, #tpu.memory_space<vmem>>, vector<1x10x512xf32>
    %2 = vector.broadcast %1 : vector<1x10x512xf32> to vector<2x10x512xf32>
    %3 = arith.addf %0, %2 : vector<2x10x512xf32>
    %c0_5 = arith.constant 0 : index
    %c0_6 = arith.constant 0 : index
    %c0_7 = arith.constant 0 : index
    %4 = vector.load %arg4[%c0_5, %c0_6, %c0_7] : memref<2x10x512xf32, #tpu.memory_space<vmem>>, vector<2x10x512xf32>
    tpu.vector_store %arg4[%c0_5, %c0_6, %c0_7], %3 {strides = array<i32>} : memref<2x10x512xf32, #tpu.memory_space<vmem>>, vector<2x10x512xf32>,
    return
  }
  func.func @transform_0(%arg0: i32, %arg1: i32) -> (i32, i32, i32) {
    %c0_i32 = arith.constant 0 : i32
    %c0_i32_0 = arith.constant 0 : i32
    return %arg1, %arg0, %c0_i32 : i32, i32, i32
  }
  func.func @transform_1(%arg0: i32, %arg1: i32) -> (i32, i32, i32) {
    %c0_i32 = arith.constant 0 : i32
    %c0_i32_0 = arith.constant 0 : i32
    %c0_i32_1 = arith.constant 0 : i32
    return %c0_i32, %arg0, %c0_i32_0 : i32, i32, i32
  }
  func.func @transform_2(%arg0: i32, %arg1: i32) -> (i32, i32, i32) {
    %c0_i32 = arith.constant 0 : i32
    %c0_i32_0 = arith.constant 0 : i32
    return %arg1, %arg0, %c0_i32 : i32, i32, i32
  }
}

</mosaic_0001>

<bundles_post_ra>
// kernel: tpu_custom_call.1
= control target key start
LH: loop header
LB: loop body
LE: loop exit
PB: predicated region body
PF: predicated region fallthrough
CT: control target
= control target key end

     0   :  { %s206_s0 = inlined_call_operand.vmem [shape: f32[2,10,512], index: 0, kind: input, shape index: {}]   ;;  %s207_s1 = inlined_call_operand.vmem [shape: f32[1,10,512], index: 1, kind: input, shape index: {}]   ;;  %s208_s2 = inlined_call_operand.vmem [shape: f32[2,10,512], index: 2, kind: output, shape index: {}]  }
   0x1   :  { %v11_v0 = vld [vmem:[%s206_s0] sm:$0xff]  ;;  %v12_v2 = vld [vmem:[%s206_s0 + $0x8] sm:$0xff]  ;;  %v13_v5 = vld [vmem:[%s206_s0 + $0x10] sm:$0xff] }
   0x2   :  { %v27_v1 = vld [vmem:[%s207_s1] sm:$0xff]  ;;  %v28_v4 = vld [vmem:[%s207_s1 + $0x8] sm:$0xff]  ;;  %v29_v6 = vld [vmem:[%s207_s1 + $0x10] sm:$0xff] }
   0x3   :  { %v35_v3 = vadd.f32 %v27_v1, %v11_v0  ;;  %v36_v7 = vadd.f32 %v28_v4, %v12_v2  ;;  %v37_v8 = vadd.f32 %v29_v6, %v13_v5  ;;  %v14_v9 = vld [vmem:[%s206_s0 + $0x18] sm:$0xff]  ;;  %v15_v11 = vld [vmem:[%s206_s0 + $0x20] sm:$0x3]  ;;  %v16_v14 = vld [vmem:[%s206_s0 + $0x28] sm:$0x3] }
   0x4   :  { %v30_v10 = vld [vmem:[%s207_s1 + $0x18] sm:$0xff]  ;;  %v31_v13 = vld [vmem:[%s207_s1 + $0x20] sm:$0x3]  ;;  %v32_v15 = vld [vmem:[%s207_s1 + $0x28] sm:$0x3] }
   0x5   :  { %51 = vst [vmem:[%s208_s2] sm:$0xff] %v35_v3  ;;  %v38_v12 = vadd.f32 %v30_v10, %v14_v9  ;;  %52 = vst [vmem:[%s208_s2 + $0x8] sm:$0xff] %v36_v7  ;;  %v39_v16 = vadd.f32 %v31_v13, %v15_v11  ;;  %v40_v17 = vadd.f32 %v32_v15, %v16_v14  ;;  %v17_v18 = vld [vmem:[%s206_s0 + $0x30] sm:$0x3]  ;;  %v18_v20 = vld [vmem:[%s206_s0 + $0x38] sm:$0x3] }
   0x6   :  { %53 = vst [vmem:[%s208_s2 + $0x10] sm:$0xff] %v37_v8  ;;  %v33_v19 = vld [vmem:[%s207_s1 + $0x30] sm:$0x3]  ;;  %v34_v22 = vld [vmem:[%s207_s1 + $0x38] sm:$0x3]  ;;  %v19_v23 = vld [vmem:[%s206_s0 + $0x40] sm:$0xff] }
   0x7   :  { %54 = vst [vmem:[%s208_s2 + $0x18] sm:$0xff] %v38_v12  ;;  %v41_v21 = vadd.f32 %v33_v19, %v17_v18  ;;  %v20_v24 = vld [vmem:[%s206_s0 + $0x48] sm:$0xff]  ;;  %55 = vst [vmem:[%s208_s2 + $0x20] sm:$0x3] %v39_v16  ;;  %v42_v25 = vadd.f32 %v34_v22, %v18_v20  ;;  %v43_v26 = vadd.f32 %v27_v1, %v19_v23  ;;  %v21_v28 = vld [vmem:[%s206_s0 + $0x50] sm:$0xff] }
   0x8   :  { %56 = vst [vmem:[%s208_s2 + $0x28] sm:$0x3] %v40_v17  ;;  %v44_v27 = vadd.f32 %v28_v4, %v20_v24  ;;  %v22_v29 = vld [vmem:[%s206_s0 + $0x58] sm:$0xff]  ;;  %v23_v30 = vld [vmem:[%s206_s0 + $0x60] sm:$0x3]  ;;  %v45_v31 = vadd.f32 %v29_v6, %v21_v28 }
   0x9   :  { %57 = vst [vmem:[%s208_s2 + $0x30] sm:$0x3] %v41_v21  ;;  %v46_v32 = vadd.f32 %v30_v10, %v22_v29  ;;  %v47_v33 = vadd.f32 %v31_v13, %v23_v30  ;;  %v24_v34 = vld [vmem:[%s206_s0 + $0x68] sm:$0x3]  ;;  %v25_v35 = vld [vmem:[%s206_s0 + $0x70] sm:$0x3] }
   0xa   :  { %v26_v36 = vld [vmem:[%s206_s0 + $0x78] sm:$0x3]  ;;  %58 = vst [vmem:[%s208_s2 + $0x38] sm:$0x3] %v42_v25  ;;  %59 = vst [vmem:[%s208_s2 + $0x40] sm:$0xff] %v43_v26  ;;  %v48_v37 = vadd.f32 %v32_v15, %v24_v34  ;;  %v49_v38 = vadd.f32 %v33_v19, %v25_v35 }
   0xb   :  { %60 = vst [vmem:[%s208_s2 + $0x48] sm:$0xff] %v44_v27  ;;  %v50_v39 = vadd.f32 %v34_v22, %v26_v36  ;;  %61 = vst [vmem:[%s208_s2 + $0x50] sm:$0xff] %v45_v31 }
   0xc   :  { %62 = vst [vmem:[%s208_s2 + $0x58] sm:$0xff] %v46_v32  ;;  %63 = vst [vmem:[%s208_s2 + $0x60] sm:$0x3] %v47_v33 }
   0xd   :  { %64 = vst [vmem:[%s208_s2 + $0x68] sm:$0x3] %v48_v37  ;;  %65 = vst [vmem:[%s208_s2 + $0x70] sm:$0x3] %v49_v38 }
   0xe   :  { %66 = vst [vmem:[%s208_s2 + $0x78] sm:$0x3] %v50_v39 }

</bundles_post_ra>
